<compile_context>
chip_gen: v6e
topology: v6e:2x2x1
jax: 0.10.0
libtpu: 0.0.40
codegen_flags: <defaults>
</compile_context>

<pallas_src>
import functools

import jax
import jax.numpy as jnp
from jax.experimental import pallas as pl
from jax.experimental.pallas import tpu as pltpu

BETA_DIM = 10
POSE_DIM = 72
HEAD_PAD = 128          # fused beta||pose head padded to one full lane group
LANE = 128
SUBLANE = 8


def _round_up(x, m):
    return ((x + m - 1) // m) * m


def make_pose_decoder_kernel(num_layers, residual_flags, compute_dtype):
    """Build a kernel body for a static layer stack.

    Ref order: z, (w0, b0), ..., (w_{L-1}, b_{L-1}), w_head, b_head, out.
    All feature dims are pre-padded to multiples of 128; pad lanes stay zero
    through ReLU / matmul / residual because padded weight rows/cols and padded
    biases are zero.
    """

    def kernel(*refs):
        z_ref = refs[0]
        out_ref = refs[-1]
        w_refs = refs[1:-1]

        z = z_ref[...].astype(jnp.float32)                       # (TB, d0_pad)

        for l in range(num_layers):                              # static unroll
            w = w_refs[2 * l][...]                               # (dl_pad, dl1_pad)
            b = w_refs[2 * l + 1][...]                           # (1,  dl1_pad) f32
            h = jnp.maximum(z, 0.0).astype(compute_dtype)        # pre-activation ReLU
            layer_out = jnp.dot(h, w, preferred_element_type=jnp.float32) + b
            if residual_flags[l]:                                # static branch
                z = z + layer_out
            else:
                z = layer_out

        # Fused lane-dense head: columns [0:10]=beta, [10:82]=pose, [82:128]=pad.
        w_h = w_refs[2 * num_layers][...]                        # (d_last_pad, 128)
        b_h = w_refs[2 * num_layers + 1][...]                    # (1, 128) f32
        head = jnp.dot(z.astype(compute_dtype), w_h,
                       preferred_element_type=jnp.float32) + b_h
        out_ref[...] = head.astype(out_ref.dtype)                # (TB, 128)

    return kernel


def pose_decoder_forward(z, params, *, compute_dtype=jnp.float32, batch_tile=128):
    """z: (B, d0) float32.  Returns (beta (B,10), pose (B,72))."""
    B, d_in = z.shape
    layers = params["layers"]
    num_layers = len(layers)

    # Logical running widths -> static residual decisions (PyTorch semantics).
    dims = [d_in]
    for (w, _) in layers:
        assert w.shape[0] == dims[-1], "layer fan_in mismatch"
        dims.append(int(w.shape[1]))
    residual_flags = tuple(dims[l + 1] == dims[l] for l in range(num_layers))

    # Lane-align every feature dim.
    dims_pad = [_round_up(d, LANE) for d in dims]

    # Batch tiling: weights resident across grid steps, batch double-buffered.
    tb = batch_tile if B >= batch_tile else _round_up(B, SUBLANE)
    b_pad = _round_up(B, tb)

    # --- pack inputs (zero pad everywhere; pads contribute nothing) ---------
    z_p = jnp.zeros((b_pad, dims_pad[0]), jnp.float32)
    z_p = z_p.at[:B, :d_in].set(z.astype(jnp.float32))

    args = [z_p]
    in_specs = [pl.BlockSpec((tb, dims_pad[0]), lambda i: (i, 0))]

    for l, (w, b) in enumerate(layers):
        w_p = jnp.zeros((dims_pad[l], dims_pad[l + 1]), compute_dtype)
        w_p = w_p.at[:dims[l], :dims[l + 1]].set(w.astype(compute_dtype))
        b_p = jnp.zeros((1, dims_pad[l + 1]), jnp.float32)
        b_p = b_p.at[:, :dims[l + 1]].set(b.astype(jnp.float32))
        args += [w_p, b_p]
        in_specs += [
            pl.BlockSpec(w_p.shape, lambda i: (0, 0)),   # VMEM-resident weight
            pl.BlockSpec(b_p.shape, lambda i: (0, 0)),
        ]

    # Fused beta||pose head, padded to one 128-lane slab.
    d_last, d_last_pad = dims[-1], dims_pad[-1]
    w_head = jnp.zeros((d_last_pad, HEAD_PAD), compute_dtype)
    w_head = w_head.at[:d_last, :BETA_DIM].set(params["w_beta"].astype(compute_dtype))
    w_head = w_head.at[:d_last, BETA_DIM:BETA_DIM + POSE_DIM].set(
        params["w_pose"].astype(compute_dtype))
    b_head = jnp.zeros((1, HEAD_PAD), jnp.float32)
    b_head = b_head.at[:, :BETA_DIM].set(params["b_beta"].astype(jnp.float32))
    b_head = b_head.at[:, BETA_DIM:BETA_DIM + POSE_DIM].set(
        params["b_pose"].astype(jnp.float32))
    args += [w_head, b_head]
    in_specs += [
        pl.BlockSpec(w_head.shape, lambda i: (0, 0)),
        pl.BlockSpec(b_head.shape, lambda i: (0, 0)),
    ]

    kernel = make_pose_decoder_kernel(num_layers, residual_flags, compute_dtype)

    out = pl.pallas_call(
        kernel,
        out_shape=jax.ShapeDtypeStruct((b_pad, HEAD_PAD), jnp.float32),
        grid_spec=pltpu.PrefetchScalarGridSpec(
            num_scalar_prefetch=0,
            grid=(b_pad // tb,),
            in_specs=in_specs,
            out_specs=pl.BlockSpec((tb, HEAD_PAD), lambda i: (i, 0)),
        ),
        compiler_params=pltpu.CompilerParams(
            # batch axis is embarrassingly parallel -> megacore / v7x 2-TC sharding
            dimension_semantics=("parallel",),
            # 48 MiB: headroom over the 32 MiB scoped default on v5e/v6e while
            # staying under v7x's 64 MiB physical VMEM with double buffering.
            vmem_limit_bytes=48 << 20,
        ),
    )(*args)

    beta = out[:B, :BETA_DIM]
    pose = out[:B, BETA_DIM:BETA_DIM + POSE_DIM]
    return beta, pose


def init_params(key, layer_dims):
    """Deterministic synthetic weights, stored as (fan_in, fan_out) = W^T."""
    n_layers = len(layer_dims) - 1
    keys = jax.random.split(key, 2 * n_layers + 4)

    def lin(kw, fan_in, fan_out):
        scale = 1.0 / jnp.sqrt(jnp.float32(fan_in))
        return jax.random.normal(kw, (fan_in, fan_out), jnp.float32) * scale

    trunk = []
    for l in range(n_layers):
        w = lin(keys[2 * l], layer_dims[l], layer_dims[l + 1])
        b = jax.random.normal(keys[2 * l + 1], (1, layer_dims[l + 1]), jnp.float32) * 0.01
        trunk.append((w, b))
    d_last = layer_dims[-1]
    return {
        "layers": trunk,
        "w_beta": lin(keys[-4], d_last, BETA_DIM),
        "b_beta": jax.random.normal(keys[-3], (1, BETA_DIM), jnp.float32) * 0.01,
        "w_pose": lin(keys[-2], d_last, POSE_DIM),
        "b_pose": jax.random.normal(keys[-1], (1, POSE_DIM), jnp.float32) * 0.01,
    }


def reference_forward(z, params):
    """Pure-JAX reference with full-precision f32 matmuls."""
    hp = jax.lax.Precision.HIGHEST
    for (w, b) in params["layers"]:
        layer_out = jnp.dot(jnp.maximum(z, 0.0), w, precision=hp) + b
        if layer_out.shape[-1] == z.shape[-1]:
            z = z + layer_out
        else:
            z = layer_out
    beta = jnp.dot(z, params["w_beta"], precision=hp) + params["b_beta"]
    pose = jnp.dot(z, params["w_pose"], precision=hp) + params["b_pose"]
    return beta, pose


if __name__ == "__main__":
    key = jax.random.PRNGKey(0)
    k_z, k_p = jax.random.split(key)

    # Small shapes; (32, 64, 64, 32) exercises both the width-change branch
    # (z <- layer_out) and the residual branch (z <- z + layer_out).
    B = 2
    layer_dims = (32, 64, 64, 32)
    z = jax.random.normal(k_z, (B, layer_dims[0]), jnp.float32)
    params = init_params(k_p, layer_dims)

    # Default compute_dtype=f32 keeps the tight check; pass jnp.bfloat16 for
    # MXU-throughput mode on v6e/v7x at real batch sizes (f32 accumulation kept).
    beta, pose = pose_decoder_forward(z, params)
    jax.block_until_ready((beta, pose))

    beta_ref, pose_ref = reference_forward(z, params)
    assert beta.shape == (B, BETA_DIM) and pose.shape == (B, POSE_DIM)
    assert jnp.allclose(beta, beta_ref, atol=1e-3, rtol=1e-3)
    assert jnp.allclose(pose, pose_ref, atol=1e-3, rtol=1e-3)

    print("KERNEL_OK")
</pallas_src>

<mosaic_0001>
module attributes {stable_mosaic.version = 11 : i64} {
  func.func @kernel(%arg0: i32, %arg1: memref<8x128xf32, #tpu.memory_space<vmem>>, %arg2: memref<128x128xf32, #tpu.memory_space<vmem>>, %arg3: memref<1x128xf32, #tpu.memory_space<vmem>>, %arg4: memref<128x128xf32, #tpu.memory_space<vmem>>, %arg5: memref<1x128xf32, #tpu.memory_space<vmem>>, %arg6: memref<128x128xf32, #tpu.memory_space<vmem>>, %arg7: memref<1x128xf32, #tpu.memory_space<vmem>>, %arg8: memref<128x128xf32, #tpu.memory_space<vmem>>, %arg9: memref<1x128xf32, #tpu.memory_space<vmem>>, %arg10: memref<8x128xf32, #tpu.memory_space<vmem>>) attributes {dimension_semantics = [#tpu.dimension_semantics<parallel>], iteration_bounds = array<i64: 1>, scalar_prefetch = 0 : i64, scratch_operands = 0 : i64, tpu.core_type = #tpu.core_type<tc>, window_params = [{transform_indices = @transform_0, window_bounds = array<i64: 8, 128>}, {pipeline_mode = #tpu.pipeline_mode<synchronous>, transform_indices = @transform_1, window_bounds = array<i64: 128, 128>}, {pipeline_mode = #tpu.pipeline_mode<synchronous>, transform_indices = @transform_2, window_bounds = array<i64: 1, 128>}, {pipeline_mode = #tpu.pipeline_mode<synchronous>, transform_indices = @transform_3, window_bounds = array<i64: 128, 128>}, {pipeline_mode = #tpu.pipeline_mode<synchronous>, transform_indices = @transform_4, window_bounds = array<i64: 1, 128>}, {pipeline_mode = #tpu.pipeline_mode<synchronous>, transform_indices = @transform_5, window_bounds = array<i64: 128, 128>}, {pipeline_mode = #tpu.pipeline_mode<synchronous>, transform_indices = @transform_6, window_bounds = array<i64: 1, 128>}, {pipeline_mode = #tpu.pipeline_mode<synchronous>, transform_indices = @transform_7, window_bounds = array<i64: 128, 128>}, {pipeline_mode = #tpu.pipeline_mode<synchronous>, transform_indices = @transform_8, window_bounds = array<i64: 1, 128>}, {transform_indices = @transform_9, window_bounds = array<i64: 8, 128>}]} {
    %c0 = arith.constant 0 : index
    %c0_0 = arith.constant 0 : index
    %0 = vector.load %arg1[%c0, %c0_0] : memref<8x128xf32, #tpu.memory_space<vmem>>, vector<8x128xf32>
    %c0_1 = arith.constant 0 : index
    %c0_2 = arith.constant 0 : index
    %1 = vector.load %arg2[%c0_1, %c0_2] : memref<128x128xf32, #tpu.memory_space<vmem>>, vector<128x128xf32>
    %c0_3 = arith.constant 0 : index
    %c0_4 = arith.constant 0 : index
    %2 = vector.load %arg3[%c0_3, %c0_4] : memref<1x128xf32, #tpu.memory_space<vmem>>, vector<1x128xf32>
    %cst = arith.constant 0.000000e+00 : f32
    %3 = vector.broadcast %cst : f32 to vector<8x128xf32>
    %4 = arith.maximumf %0, %3 : vector<8x128xf32>
    %cst_5 = arith.constant dense<0.000000e+00> : vector<8x128xf32>
    %5 = tpu.matmul %4, %1, %cst_5 {dimension_numbers = #tpu.dot_dimension_numbers<[1], [0], [0], [1], [0, 0, 1, 1], [], []>} : vector<8x128xf32>, vector<128x128xf32>, vector<8x128xf32> -> vector<8x128xf32>
    %6 = vector.broadcast %2 : vector<1x128xf32> to vector<8x128xf32>
    %7 = arith.addf %5, %6 : vector<8x128xf32>
    %c0_6 = arith.constant 0 : index
    %c0_7 = arith.constant 0 : index
    %8 = vector.load %arg4[%c0_6, %c0_7] : memref<128x128xf32, #tpu.memory_space<vmem>>, vector<128x128xf32>
    %c0_8 = arith.constant 0 : index
    %c0_9 = arith.constant 0 : index
    %9 = vector.load %arg5[%c0_8, %c0_9] : memref<1x128xf32, #tpu.memory_space<vmem>>, vector<1x128xf32>
    %cst_10 = arith.constant 0.000000e+00 : f32
    %10 = vector.broadcast %cst_10 : f32 to vector<8x128xf32>
    %11 = arith.maximumf %7, %10 : vector<8x128xf32>
    %cst_11 = arith.constant dense<0.000000e+00> : vector<8x128xf32>
    %12 = tpu.matmul %11, %8, %cst_11 {dimension_numbers = #tpu.dot_dimension_numbers<[1], [0], [0], [1], [0, 0, 1, 1], [], []>} : vector<8x128xf32>, vector<128x128xf32>, vector<8x128xf32> -> vector<8x128xf32>
    %13 = vector.broadcast %9 : vector<1x128xf32> to vector<8x128xf32>
    %14 = arith.addf %12, %13 : vector<8x128xf32>
    %15 = arith.addf %7, %14 : vector<8x128xf32>
    %c0_12 = arith.constant 0 : index
    %c0_13 = arith.constant 0 : index
    %16 = vector.load %arg6[%c0_12, %c0_13] : memref<128x128xf32, #tpu.memory_space<vmem>>, vector<128x128xf32>
    %c0_14 = arith.constant 0 : index
    %c0_15 = arith.constant 0 : index
    %17 = vector.load %arg7[%c0_14, %c0_15] : memref<1x128xf32, #tpu.memory_space<vmem>>, vector<1x128xf32>
    %cst_16 = arith.constant 0.000000e+00 : f32
    %18 = vector.broadcast %cst_16 : f32 to vector<8x128xf32>
    %19 = arith.maximumf %15, %18 : vector<8x128xf32>
    %cst_17 = arith.constant dense<0.000000e+00> : vector<8x128xf32>
    %20 = tpu.matmul %19, %16, %cst_17 {dimension_numbers = #tpu.dot_dimension_numbers<[1], [0], [0], [1], [0, 0, 1, 1], [], []>} : vector<8x128xf32>, vector<128x128xf32>, vector<8x128xf32> -> vector<8x128xf32>
    %21 = vector.broadcast %17 : vector<1x128xf32> to vector<8x128xf32>
    %22 = arith.addf %20, %21 : vector<8x128xf32>
    %c0_18 = arith.constant 0 : index
    %c0_19 = arith.constant 0 : index
    %23 = vector.load %arg8[%c0_18, %c0_19] : memref<128x128xf32, #tpu.memory_space<vmem>>, vector<128x128xf32>
    %c0_20 = arith.constant 0 : index
    %c0_21 = arith.constant 0 : index
    %24 = vector.load %arg9[%c0_20, %c0_21] : memref<1x128xf32, #tpu.memory_space<vmem>>, vector<1x128xf32>
    %cst_22 = arith.constant dense<0.000000e+00> : vector<8x128xf32>
    %25 = tpu.matmul %22, %23, %cst_22 {dimension_numbers = #tpu.dot_dimension_numbers<[1], [0], [0], [1], [0, 0, 1, 1], [], []>} : vector<8x128xf32>, vector<128x128xf32>, vector<8x128xf32> -> vector<8x128xf32>
    %26 = vector.broadcast %24 : vector<1x128xf32> to vector<8x128xf32>
    %27 = arith.addf %25, %26 : vector<8x128xf32>
    %c0_23 = arith.constant 0 : index
    %c0_24 = arith.constant 0 : index
    %28 = vector.load %arg10[%c0_23, %c0_24] : memref<8x128xf32, #tpu.memory_space<vmem>>, vector<8x128xf32>
    tpu.vector_store %arg10[%c0_23, %c0_24], %27 {strides = array<i32>} : memref<8x128xf32, #tpu.memory_space<vmem>>, vector<8x128xf32>,
    return
  }
  func.func @transform_0(%arg0: i32) -> (i32, i32) {
    %c0_i32 = arith.constant 0 : i32
    %c0_i32_0 = arith.constant 0 : i32
    return %arg0, %c0_i32 : i32, i32
  }
  func.func @transform_1(%arg0: i32) -> (i32, i32) {
    %c0_i32 = arith.constant 0 : i32
    %c0_i32_0 = arith.constant 0 : i32
    %c0_i32_1 = arith.constant 0 : i32
    return %c0_i32, %c0_i32_0 : i32, i32
  }
  func.func @transform_2(%arg0: i32) -> (i32, i32) {
    %c0_i32 = arith.constant 0 : i32
    %c0_i32_0 = arith.constant 0 : i32
    %c0_i32_1 = arith.constant 0 : i32
    return %c0_i32, %c0_i32_0 : i32, i32
  }
  func.func @transform_3(%arg0: i32) -> (i32, i32) {
    %c0_i32 = arith.constant 0 : i32
    %c0_i32_0 = arith.constant 0 : i32
    %c0_i32_1 = arith.constant 0 : i32
    return %c0_i32, %c0_i32_0 : i32, i32
  }
  func.func @transform_4(%arg0: i32) -> (i32, i32) {
    %c0_i32 = arith.constant 0 : i32
    %c0_i32_0 = arith.constant 0 : i32
    %c0_i32_1 = arith.constant 0 : i32
    return %c0_i32, %c0_i32_0 : i32, i32
  }
  func.func @transform_5(%arg0: i32) -> (i32, i32) {
    %c0_i32 = arith.constant 0 : i32
    %c0_i32_0 = arith.constant 0 : i32
    %c0_i32_1 = arith.constant 0 : i32
    return %c0_i32, %c0_i32_0 : i32, i32
  }
  func.func @transform_6(%arg0: i32) -> (i32, i32) {
    %c0_i32 = arith.constant 0 : i32
    %c0_i32_0 = arith.constant 0 : i32
    %c0_i32_1 = arith.constant 0 : i32
    return %c0_i32, %c0_i32_0 : i32, i32
  }
  func.func @transform_7(%arg0: i32) -> (i32, i32) {
    %c0_i32 = arith.constant 0 : i32
    %c0_i32_0 = arith.constant 0 : i32
    %c0_i32_1 = arith.constant 0 : i32
    return %c0_i32, %c0_i32_0 : i32, i32
  }
  func.func @transform_8(%arg0: i32) -> (i32, i32) {
    %c0_i32 = arith.constant 0 : i32
    %c0_i32_0 = arith.constant 0 : i32
    %c0_i32_1 = arith.constant 0 : i32
    return %c0_i32, %c0_i32_0 : i32, i32
  }
  func.func @transform_9(%arg0: i32) -> (i32, i32) {
    %c0_i32 = arith.constant 0 : i32
    %c0_i32_0 = arith.constant 0 : i32
    return %arg0, %c0_i32 : i32, i32
  }
}

</mosaic_0001>

<bundles_post_ra>
// kernel: tpu_custom_call.1
= control target key start
LH: loop header
LB: loop body
LE: loop exit
PB: predicated region body
PF: predicated region fallthrough
CT: control target
= control target key end

     0   :  { %14 = vsyncpa [#allocation3], 0  ;;  %s1018_s0 = inlined_call_operand.hbm [shape: f32[8,128], index: 0, kind: input, shape index: {}]   ;;  %s1019_s1 = inlined_call_operand.hbm [shape: f32[128,128], index: 1, kind: input, shape index: {}]   ;;  %s1020_s2 = inlined_call_operand.vmem [shape: f32[1,128], index: 2, kind: input, shape index: {}]   ;;  %s1021_s3 = inlined_call_operand.hbm [shape: f32[128,128], index: 3, kind: input, shape index: {}]   ;;  %s1022_s4 = inlined_call_operand.vmem [shape: f32[1,128], index: 4, kind: input, shape index: {}]   ;;  %s1023_s5 = inlined_call_operand.hbm [shape: f32[128,128], index: 5, kind: input, shape index: {}]   ;;  %s1024_s6 = inlined_call_operand.vmem [shape: f32[1,128], index: 6, kind: input, shape index: {}]   ;;  %s1025_s7 = inlined_call_operand.hbm [shape: f32[128,128], index: 7, kind: input, shape index: {}]   ;;  %s1026_s8 = inlined_call_operand.vmem [shape: f32[1,128], index: 8, kind: input, shape index: {}]   ;;  %s1027_s9 = inlined_call_operand.hbm [shape: f32[8,128], index: 9, kind: output, shape index: {}]  }
   0x1   :  { %15 = vsyncpa [#allocation6], 0 }
   0x2   :  { %16 = vsyncpa [#allocation9], 0 }
   0x3   :  { %17 = vsyncpa [#allocation4], 0  ;;  %s844_s30 = smov [#allocation5]  }
   0x4   :  { %s33_s10 = sshll.u32 %s844_s30, 4  ;;  %s34_s10 = int_to_ptr.vmem [resolvable:$true] %s33_s10 }
   0x5   :  { %s724_s11 = scalar_lea.vmem %s34_s10, 2048  ;;  %p729_p1 = scmp.lt.s32.totalorder %s34_s10, %s34_s10 }
   0x6   :  { %p725_p0 = scmp.ne.s32.totalorder %s34_s10, %s724_s11  ;;  %p730_p2 = scmp.lt.s32.totalorder %s724_s11, %s724_s11 }
   0x8   :  { %p731_p3 = por %p730_p2, %p729_p1 }
   0xa   :  { %p732_p4 = pnand %p731_p3, %p725_p0 }
   0xc   :  { %735 = shalt.err (!%p732_p4)
}
   0xd   :  { %s845_s12 = smov 128   ;;  %s846_s13 = smov 8  }
   0xe   :  { %39 = dma.hbm_to_vmem [thread:$0]  %s1019_s1, 2048, %s34_s10, [#allocation6], %s845_s12, %s845_s12, %s846_s13  }
   0xf   :  { %s847_s16 = smov [#allocation8]   ;;  %s848_s18 = smov [#allocation2]  }
  0x10   :  { %s61_s17 = sshll.u32 %s847_s16, 4  ;;  %s24_s19 = sshll.u32 %s848_s18, 4  ;;  %s62_s17 = int_to_ptr.vmem [resolvable:$true] %s61_s17  ;;  %s25_s19 = int_to_ptr.vmem [resolvable:$true] %s24_s19 }
  0x11   :  { %s744_s20 = scalar_lea.vmem %s62_s17, 2048  ;;  %p749_p6 = scmp.lt.s32.totalorder %s62_s17, %s62_s17 }
  0x12   :  { %p745_p5 = scmp.ne.s32.totalorder %s62_s17, %s744_s20  ;;  %p750_p7 = scmp.lt.s32.totalorder %s744_s20, %s744_s20 }
  0x14   :  { %p751_p8 = por %p750_p7, %p749_p6 }
  0x16   :  { %p752_p9 = pnand %p751_p8, %p745_p5 }
  0x18   :  { %755 = shalt.err (!%p752_p9)
}
  0x19   :  { %67 = dma.hbm_to_vmem [thread:$0]  %s1023_s5, 2048, %s62_s17, [#allocation9], %s845_s12, %s845_s12, %s846_s13  }
  0x1a   :  { %s764_s1 = scalar_lea.vmem %s25_s19, 128  ;;  %p769_p11 = scmp.lt.s32.totalorder %s25_s19, %s25_s19 }
  0x1b   :  { %p765_p10 = scmp.ne.s32.totalorder %s25_s19, %s764_s1  ;;  %p770_p12 = scmp.lt.s32.totalorder %s764_s1, %s764_s1 }
  0x1d   :  { %p771_p13 = por %p770_p12, %p769_p11 }
  0x1f   :  { %p772_p0 = pnand %p771_p13, %p765_p10 }
  0x21   :  { %775 = shalt.err (!%p772_p0)
}
  0x22   :  { %27 = dma.hbm_to_vmem [thread:$0]  %s1018_s0, 128, %s25_s19, [#allocation3]  }
  0x23   :  { %s849_s25 = smov [#allocation7]   ;;  %s850_s27 = smov [#allocation10]  }
  0x24   :  { %s47_s26 = sshll.u32 %s849_s25, 4  ;;  %s75_s28 = sshll.u32 %s850_s27, 4  ;;  %s48_s26 = int_to_ptr.vmem [resolvable:$true] %s47_s26  ;;  %s76_s28 = int_to_ptr.vmem [resolvable:$true] %s75_s28 }
  0x25   :  { %s784_s29 = scalar_lea.vmem %s48_s26, 2048  ;;  %p789_p2 = scmp.lt.s32.totalorder %s48_s26, %s48_s26 }
  0x26   :  { %p785_p1 = scmp.ne.s32.totalorder %s48_s26, %s784_s29  ;;  %p790_p3 = scmp.lt.s32.totalorder %s784_s29, %s784_s29 }
  0x28   :  { %p791_p4 = por %p790_p3, %p789_p2 }
  0x2a   :  { %p792_p5 = pnand %p791_p4, %p785_p1 }
  0x2c   :  { %795 = shalt.err (!%p792_p5)
}
  0x2d   :  { %53 = dma.hbm_to_vmem [thread:$0]  %s1021_s3, 2048, %s48_s26, [#allocation6], %s845_s12, %s845_s12, %s846_s13  }
  0x2e   :  { %s804_s0 = scalar_lea.vmem %s76_s28, 2048  ;;  %p809_p7 = scmp.lt.s32.totalorder %s76_s28, %s76_s28 }
  0x2f   :  { %p805_p6 = scmp.ne.s32.totalorder %s76_s28, %s804_s0  ;;  %p810_p8 = scmp.lt.s32.totalorder %s804_s0, %s804_s0 }
  0x31   :  { %p811_p9 = por %p810_p8, %p809_p7 }
  0x33   :  { %p812_p10 = pnand %p811_p9, %p805_p6 }
  0x35   :  { %815 = shalt.err (!%p812_p10)
}
  0x36   :  { %81 = dma.hbm_to_vmem [thread:$0]  %s1025_s7, 2048, %s76_s28, [#allocation9], %s845_s12, %s845_s12, %s846_s13  }
  0x37   :  { %836 = dma.done.wait [#allocation3], 128  }
  0x38   :  { %837 = vsyncadd [#allocation3], 4294967168 }
  0x39   :  { %838 = dma.done.wait [#allocation6], 4096  }
  0x3a   :  { %839 = vsyncadd [#allocation6], 4294963200 }
  0x3b   :  { %840 = dma.done.wait [#allocation9], 4096  }
  0x3c   :  { %841 = vsyncadd [#allocation9], 4294963200  ;;  %v851_v0 = vmov 0.0   ;;  %vm852_vm0 = vmmov 0   ;;  %v115_v1 = vld [vmem:[#allocation5 + $0x78] sm:$0xff]  ;;  %v114_v2 = vld [vmem:[#allocation5 + $0x70] sm:$0xff] }
  0x3d   :  { %566 = vmatprep.subr.mxu0 %v851_v0  ;;  %598 = vmatprep.mubr.msk.f32.mxu0 %vm852_vm0, %v851_v0  ;;  %v113_v3 = vld [vmem:[#allocation5 + $0x68] sm:$0xff]  ;;  %v112_v4 = vld [vmem:[#allocation5 + $0x60] sm:$0xff]  ;;  %v209_v5 = vld [vmem:[#allocation7 + $0x78] sm:$0xff]  ;;  %s853_s16 = smov [#allocation11]  }
  0x3e   :  { %601 = vmatprep.subr.mxu1 %v851_v0  ;;  %633 = vmatprep.mubr.msk.f32.mxu1 %vm852_vm0, %v851_v0  ;;  %v111_v6 = vld [vmem:[#allocation5 + $0x58] sm:$0xff]  ;;  %v208_v7 = vld [vmem:[#allocation7 + $0x70] sm:$0xff]  ;;  %v207_v8 = vld [vmem:[#allocation7 + $0x68] sm:$0xff]  ;;  %s483_s17 = sshll.u32 %s853_s16, 4  ;;  %s484_s17 = int_to_ptr.vmem [resolvable:$true] %s483_s17 }
  0x3f   :  { %567 = vmatpush3.msra.mxu0 %v115_v1  ;;  %602 = vmatpush3.msra.mxu1 %v209_v5  ;;  %v110_v9 = vld [vmem:[#allocation5 + $0x50] sm:$0xff]  ;;  %v206_v10 = vld [vmem:[#allocation7 + $0x60] sm:$0xff]  ;;  %v109_v11 = vld [vmem:[#allocation5 + $0x48] sm:$0xff]  ;;  %s816_s18 = scalar_lea.vmem %s484_s17, 128  ;;  %p821_p12 = scmp.lt.s32.totalorder %s484_s17, %s484_s17 }
  0x40   :  { %568 = vmatprep.subr.mxu0 %v851_v0  ;;  %603 = vmatprep.subr.mxu1 %v851_v0  ;;  %v205_v12 = vld [vmem:[#allocation7 + $0x58] sm:$0xff]  ;;  %v108_v13 = vld [vmem:[#allocation5 + $0x40] sm:$0xff]  ;;  %v204_v14 = vld [vmem:[#allocation7 + $0x50] sm:$0xff]  ;;  %p817_p11 = scmp.ne.s32.totalorder %s484_s17, %s816_s18  ;;  %p822_p13 = scmp.lt.s32.totalorder %s816_s18, %s816_s18 }
  0x41   :  { %569 = vmatpush3.msra.mxu0 %v114_v2  ;;  %604 = vmatpush3.msra.mxu1 %v208_v7  ;;  %v107_v15 = vld [vmem:[#allocation5 + $0x38] sm:$0xff]  ;;  %v203_v16 = vld [vmem:[#allocation7 + $0x48] sm:$0xff]  ;;  %v106_v17 = vld [vmem:[#allocation5 + $0x30] sm:$0xff] }
  0x42   :  { %570 = vmatprep.subr.mxu0 %v851_v0  ;;  %605 = vmatprep.subr.mxu1 %v851_v0  ;;  %v202_v18 = vld [vmem:[#allocation7 + $0x40] sm:$0xff]  ;;  %v105_v19 = vld [vmem:[#allocation5 + $0x28] sm:$0xff]  ;;  %v201_v20 = vld [vmem:[#allocation7 + $0x38] sm:$0xff]  ;;  %p823_p0 = por %p822_p13, %p821_p12 }
  0x43   :  { %571 = vmatpush3.msra.mxu0 %v113_v3  ;;  %606 = vmatpush3.msra.mxu1 %v207_v8  ;;  %v104_v21 = vld [vmem:[#allocation5 + $0x20] sm:$0xff]  ;;  %v200_v22 = vld [vmem:[#allocation7 + $0x30] sm:$0xff]  ;;  %v103_v23 = vld [vmem:[#allocation5 + $0x18] sm:$0xff] }
  0x44   :  { %572 = vmatprep.subr.mxu0 %v851_v0  ;;  %607 = vmatprep.subr.mxu1 %v851_v0  ;;  %v199_v24 = vld [vmem:[#allocation7 + $0x28] sm:$0xff]  ;;  %v102_v25 = vld [vmem:[#allocation5 + $0x10] sm:$0xff]  ;;  %v99_v26 = vld [vmem:[#allocation2] sm:$0xff]  ;;  %p824_p1 = pnand %p823_p0, %p817_p11 }
  0x45   :  { %573 = vmatpush3.msra.mxu0 %v112_v4  ;;  %608 = vmatpush3.msra.mxu1 %v206_v10  ;;  %v198_v27 = vld [vmem:[#allocation7 + $0x20] sm:$0xff]  ;;  %v101_v28 = vld [vmem:[#allocation5 + $0x8] sm:$0xff]  ;;  %v197_v29 = vld [vmem:[#allocation7 + $0x18] sm:$0xff]  ;;  %v117_v31 = vmax.f32 %v99_v26, 0.0 }
  0x46   :  { %574 = vmatprep.subr.mxu0 %v851_v0  ;;  %609 = vmatprep.subr.mxu1 %v851_v0  ;;  %v100_v30 = vld [vmem:[#allocation5] sm:$0xff]  ;;  %v196_v32 = vld [vmem:[#allocation7 + $0x10] sm:$0xff]  ;;  %v195_v33 = vld [vmem:[#allocation7 + $0x8] sm:$0xff] }
  0x47   :  { %575 = vmatpush3.msra.mxu0 %v111_v6  ;;  %610 = vmatpush3.msra.mxu1 %v205_v12  ;;  %v194_v34 = vld [vmem:[#allocation7] sm:$0xff]  ;;  %v304_v35 = vld [vmem:[#allocation8 + $0x78] sm:$0xff]  ;;  %v303_v36 = vld [vmem:[#allocation8 + $0x70] sm:$0xff] }
  0x48   :  { %576 = vmatprep.subr.mxu0 %v851_v0  ;;  %611 = vmatprep.subr.mxu1 %v851_v0  ;;  %v302_v37 = vld [vmem:[#allocation8 + $0x68] sm:$0xff]  ;;  %v301_v38 = vld [vmem:[#allocation8 + $0x60] sm:$0xff]  ;;  %v300_v39 = vld [vmem:[#allocation8 + $0x58] sm:$0xff] }
  0x49   :  { %577 = vmatpush3.msra.mxu0 %v110_v9  ;;  %612 = vmatpush3.msra.mxu1 %v204_v14  ;;  %v299_v40 = vld [vmem:[#allocation8 + $0x50] sm:$0xff]  ;;  %v298_v41 = vld [vmem:[#allocation8 + $0x48] sm:$0xff]  ;;  %v297_v42 = vld [vmem:[#allocation8 + $0x40] sm:$0xff] }
  0x4a   :  { %578 = vmatprep.subr.mxu0 %v851_v0  ;;  %613 = vmatprep.subr.mxu1 %v851_v0  ;;  %v296_v43 = vld [vmem:[#allocation8 + $0x38] sm:$0xff]  ;;  %v295_v44 = vld [vmem:[#allocation8 + $0x30] sm:$0xff]  ;;  %v294_v45 = vld [vmem:[#allocation8 + $0x28] sm:$0xff] }
  0x4b   :  { %579 = vmatpush3.msra.mxu0 %v109_v11  ;;  %614 = vmatpush3.msra.mxu1 %v203_v16  ;;  %v293_v46 = vld [vmem:[#allocation8 + $0x20] sm:$0xff]  ;;  %v494_v47 = vld [vmem:[%s1020_s2] ss:$0 sm:$0xff]  ;;  %v291_v53 = vld [vmem:[#allocation8 + $0x10] sm:$0xff] }
  0x4c   :  { %580 = vmatprep.subr.mxu0 %v851_v0  ;;  %615 = vmatprep.subr.mxu1 %v851_v0  ;;  %v292_v52 = vld [vmem:[#allocation8 + $0x18] sm:$0xff]  ;;  %v290_v54 = vld [vmem:[#allocation8 + $0x8] sm:$0xff]  ;;  %v289_v55 = vld [vmem:[#allocation8] sm:$0xff] }
  0x4d   :  { %581 = vmatpush3.msra.mxu0 %v108_v13  ;;  %616 = vmatpush3.msra.mxu1 %v202_v18  ;;  %v398_v56 = vld [vmem:[#allocation10 + $0x78] sm:$0xff]  ;;  %v397_v57 = vld [vmem:[#allocation10 + $0x70] sm:$0xff]  ;;  %v396_v58 = vld [vmem:[#allocation10 + $0x68] sm:$0xff] }
  0x4e   :  { %582 = vmatprep.subr.mxu0 %v851_v0  ;;  %617 = vmatprep.subr.mxu1 %v851_v0  ;;  %v395_v59 = vld [vmem:[#allocation10 + $0x60] sm:$0xff]  ;;  %v394_v60 = vld [vmem:[#allocation10 + $0x58] sm:$0xff]  ;;  %v393_v61 = vld [vmem:[#allocation10 + $0x50] sm:$0xff] }
  0x4f   :  { %583 = vmatpush3.msra.mxu0 %v107_v15  ;;  %618 = vmatpush3.msra.mxu1 %v201_v20  ;;  %v392_v62 = vld [vmem:[#allocation10 + $0x48] sm:$0xff]  ;;  %v391_v63 = vld [vmem:[#allocation10 + $0x40] sm:$0xff]  ;;  %v390_v1 = vld [vmem:[#allocation10 + $0x38] sm:$0xff] }
  0x50   :  { %584 = vmatprep.subr.mxu0 %v851_v0  ;;  %619 = vmatprep.subr.mxu1 %v851_v0  ;;  %v389_v2 = vld [vmem:[#allocation10 + $0x30] sm:$0xff]  ;;  %v388_v3 = vld [vmem:[#allocation10 + $0x28] sm:$0xff]  ;;  %v387_v4 = vld [vmem:[#allocation10 + $0x20] sm:$0xff] }
  0x51   :  { %585 = vmatpush3.msra.mxu0 %v106_v17  ;;  %620 = vmatpush3.msra.mxu1 %v200_v22  ;;  %v386_v5 = vld [vmem:[#allocation10 + $0x18] sm:$0xff]  ;;  %v385_v6 = vld [vmem:[#allocation10 + $0x10] sm:$0xff]  ;;  %v384_v13 = vld [vmem:[#allocation10 + $0x8] sm:$0xff] }
  0x52   :  { %586 = vmatprep.subr.mxu0 %v851_v0  ;;  %621 = vmatprep.subr.mxu1 %v851_v0  ;;  %v495_v7 = vld [vmem:[%s1022_s4] ss:$0 sm:$0xff]  ;;  %v383_v14 = vld [vmem:[#allocation10] sm:$0xff] }
  0x53   :  { %587 = vmatpush3.msra.mxu0 %v105_v19  ;;  %622 = vmatpush3.msra.mxu1 %v199_v24  ;;  %v496_v15 = vld [vmem:[%s1024_s6] ss:$0 sm:$0xff] }
  0x54   :  { %588 = vmatprep.subr.mxu0 %v851_v0  ;;  %623 = vmatprep.subr.mxu1 %v851_v0  ;;  %v497_v19 = vld [vmem:[%s1026_s8] ss:$0 sm:$0xff] }
  0x55   :  { %589 = vmatpush3.msra.mxu0 %v104_v21  ;;  %624 = vmatpush3.msra.mxu1 %v198_v27 }
  0x56   :  { %590 = vmatprep.subr.mxu0 %v851_v0  ;;  %625 = vmatprep.subr.mxu1 %v851_v0 }
  0x57   :  { %591 = vmatpush3.msra.mxu0 %v103_v23  ;;  %626 = vmatpush3.msra.mxu1 %v197_v29 }
  0x58   :  { %592 = vmatprep.subr.mxu0 %v851_v0  ;;  %627 = vmatprep.subr.mxu1 %v851_v0 }
  0x59   :  { %593 = vmatpush3.msra.mxu0 %v102_v25  ;;  %628 = vmatpush3.msra.mxu1 %v196_v32 }
  0x5a   :  { %594 = vmatprep.subr.mxu0 %v851_v0  ;;  %629 = vmatprep.subr.mxu1 %v851_v0 }
  0x5b   :  { %595 = vmatpush3.msra.mxu0 %v101_v28  ;;  %630 = vmatpush3.msra.mxu1 %v195_v33 }
  0x5c   :  { %596 = vmatprep.subr.mxu0 %v851_v0  ;;  %631 = vmatprep.subr.mxu1 %v851_v0 }
  0x5d   :  { %597 = vmatpush3.msra.mxu0 %v100_v30  ;;  %632 = vmatpush3.msra.mxu1 %v194_v34 }
  0x5e   :  { %599 = vmatmul.mubr.f32.vlgmr.msra.gmra.mxu0 %v117_v31  ;;  %636 = vmatprep.subr.mxu0 %v851_v0 }
  0x5f   :  { %668 = vmatprep.mubr.msk.f32.mxu0 %vm852_vm0, %v851_v0  ;;  %671 = vmatprep.subr.mxu1 %v851_v0 }
  0x60   :  { %637 = vmatpush3.msra.mxu0 %v304_v35 }
  0x61   :  { %638 = vmatprep.subr.mxu0 %v851_v0 }
  0x62   :  { %639 = vmatpush3.msra.mxu0 %v303_v36 }
  0x63   :  { %640 = vmatprep.subr.mxu0 %v851_v0 }
  0x64   :  { %641 = vmatpush3.msra.mxu0 %v302_v37 }
  0x65   :  { %642 = vmatprep.subr.mxu0 %v851_v0 }
  0x66   :  { %643 = vmatpush3.msra.mxu0 %v301_v38 }
  0x67   :  { %644 = vmatprep.subr.mxu0 %v851_v0 }
  0x68   :  { %645 = vmatpush3.msra.mxu0 %v300_v39 }
  0x69   :  { %646 = vmatprep.subr.mxu0 %v851_v0 }
  0x6a   :  { %647 = vmatpush3.msra.mxu0 %v299_v40 }
  0x6b   :  { %648 = vmatprep.subr.mxu0 %v851_v0 }
  0x6c   :  { %649 = vmatpush3.msra.mxu0 %v298_v41 }
  0x6d   :  { %650 = vmatprep.subr.mxu0 %v851_v0 }
  0x6e   :  { %651 = vmatpush3.msra.mxu0 %v297_v42 }
  0x6f   :  { %652 = vmatprep.subr.mxu0 %v851_v0 }
  0x70   :  { %653 = vmatpush3.msra.mxu0 %v296_v43 }
  0x71   :  { %654 = vmatprep.subr.mxu0 %v851_v0 }
  0x72   :  { %655 = vmatpush3.msra.mxu0 %v295_v44 }
  0x73   :  { %656 = vmatprep.subr.mxu0 %v851_v0 }
  0x74   :  { %657 = vmatpush3.msra.mxu0 %v294_v45 }
  0x75   :  { %658 = vmatprep.subr.mxu0 %v851_v0 }
  0x76   :  { %659 = vmatpush3.msra.mxu0 %v293_v46 }
  0x77   :  { %660 = vmatprep.subr.mxu0 %v851_v0 }
  0x78   :  { %661 = vmatpush3.msra.mxu0 %v292_v52 }
  0x79   :  { %662 = vmatprep.subr.mxu0 %v851_v0 }
  0x7a   :  { %663 = vmatpush3.msra.mxu0 %v291_v53 }
  0x7b   :  { %664 = vmatprep.subr.mxu0 %v851_v0 }
  0x7c   :  { %665 = vmatpush3.msra.mxu0 %v290_v54 }
  0x7d   :  { %666 = vmatprep.subr.mxu0 %v851_v0 }
  0x7e   :  { %667 = vmatpush3.msra.mxu0 %v289_v55 }
 0x11e   :  { %v190_v48 = vpop.f32.mrf.mxu0 }
 0x11f   :  { %v191_v49 = vadd.f32 %v494_v47, %v190_v48 }
 0x120   :  { %v600_v50 = vpop.f32.mrf.mxu0 }
 0x121   :  { %v211_v51 = vmax.f32 %v191_v49, 0.0 }
 0x123   :  { %634 = vmatmul.mubr.f32.vlgmr.msra.gmra.mxu1 %v211_v51 }
 0x124   :  { %703 = vmatprep.mubr.msk.f32.mxu1 %vm852_vm0, %v851_v0  ;;  %672 = vmatpush3.msra.mxu1 %v398_v56 }
 0x125   :  { %673 = vmatprep.subr.mxu1 %v851_v0 }
 0x126   :  { %674 = vmatpush3.msra.mxu1 %v397_v57 }
 0x127   :  { %675 = vmatprep.subr.mxu1 %v851_v0 }
 0x128   :  { %676 = vmatpush3.msra.mxu1 %v396_v58 }
 0x129   :  { %677 = vmatprep.subr.mxu1 %v851_v0 }
 0x12a   :  { %678 = vmatpush3.msra.mxu1 %v395_v59 }
 0x12b   :  { %679 = vmatprep.subr.mxu1 %v851_v0 }
 0x12c   :  { %680 = vmatpush3.msra.mxu1 %v394_v60 }
 0x12d   :  { %681 = vmatprep.subr.mxu1 %v851_v0 }
 0x12e   :  { %682 = vmatpush3.msra.mxu1 %v393_v61 }
 0x12f   :  { %683 = vmatprep.subr.mxu1 %v851_v0 }
 0x130   :  { %684 = vmatpush3.msra.mxu1 %v392_v62 }
 0x131   :  { %685 = vmatprep.subr.mxu1 %v851_v0 }
 0x132   :  { %686 = vmatpush3.msra.mxu1 %v391_v63 }
 0x133   :  { %687 = vmatprep.subr.mxu1 %v851_v0 }
 0x134   :  { %688 = vmatpush3.msra.mxu1 %v390_v1 }
 0x135   :  { %689 = vmatprep.subr.mxu1 %v851_v0 }
 0x136   :  { %690 = vmatpush3.msra.mxu1 %v389_v2 }
 0x137   :  { %691 = vmatprep.subr.mxu1 %v851_v0 }
 0x138   :  { %692 = vmatpush3.msra.mxu1 %v388_v3 }
 0x139   :  { %693 = vmatprep.subr.mxu1 %v851_v0 }
 0x13a   :  { %694 = vmatpush3.msra.mxu1 %v387_v4 }
 0x13b   :  { %695 = vmatprep.subr.mxu1 %v851_v0 }
 0x13c   :  { %696 = vmatpush3.msra.mxu1 %v386_v5 }
 0x13d   :  { %697 = vmatprep.subr.mxu1 %v851_v0 }
 0x13e   :  { %698 = vmatpush3.msra.mxu1 %v385_v6 }
 0x13f   :  { %699 = vmatprep.subr.mxu1 %v851_v0 }
 0x140   :  { %700 = vmatpush3.msra.mxu1 %v384_v13 }
 0x141   :  { %701 = vmatprep.subr.mxu1 %v851_v0 }
 0x142   :  { %702 = vmatpush3.msra.mxu1 %v383_v14 }
 0x1e3   :  { %v284_v8 = vpop.f32.mrf.mxu1 }
 0x1e4   :  { %v285_v9 = vadd.f32 %v495_v7, %v284_v8 }
 0x1e5   :  { %v635_v10 = vpop.f32.mrf.mxu1 }
 0x1e6   :  { %v288_v11 = vadd.f32 %v285_v9, %v191_v49 }
 0x1e8   :  { %v306_v12 = vmax.f32 %v288_v11, 0.0 }
 0x1ea   :  { %669 = vmatmul.mubr.f32.vlgmr.msra.gmra.mxu0 %v306_v12 }
 0x2aa   :  { %v379_v16 = vpop.f32.mrf.mxu0 }
 0x2ab   :  { %v380_v17 = vadd.f32 %v496_v15, %v379_v16 }
 0x2ac   :  { %v670_v18 = vpop.f32.mrf.mxu0 }
 0x2ad   :  { %704 = vmatmul.mubr.f32.vlgmr.msra.gmra.mxu1 %v380_v17 }
 0x36d   :  { %v472_v20 = vpop.f32.mrf.mxu1 }
 0x36e   :  { %v473_v21 = vadd.f32 %v497_v19, %v472_v20 }
 0x36f   :  { %v705_v0 = vpop.f32.mrf.mxu1 }
 0x370   :  { %476 = vst [vmem:[#allocation11] sm:$0xff] %v473_v21 }
 0x371   :  { %827 = shalt.err (!%p824_p1)
}
 0x372   :  { %486 = dma.vmem_to_hbm [thread:$0]  %s484_s17, 128, %s1027_s9, [#allocation4]  }
 0x373   :  { %842 = dma.done.wait [#allocation4], 128  }
 0x374   :  { %843 = vsyncadd [#allocation4], 4294967168 }
 0x375   :  { %490 = vsyncpa [#allocation3], 1 }
 0x376   :  { %491 = vsyncpa [#allocation6], 1 }
 0x377   :  { %492 = vsyncpa [#allocation9], 1 }
 0x378   :  { %493 = vsyncpa [#allocation4], 1 }

</bundles_post_ra>
